<compile_context>
chip_gen: v5e
topology: v5e:2x2
jax: 0.10.0
libtpu: 0.0.40
codegen_flags: <defaults>
</compile_context>

<pallas_src>
import jax
import jax.numpy as jnp
from jax.experimental import pallas as pl
from jax.experimental.pallas import tpu as pltpu

_LANE = 128


def _ff_kernel(x_ref, w1_ref, b1_ref, w2_ref, b2_ref, o_ref):
    # x_ref:  [D_in, tb]  feature-major activation tile
    # w1_ref: [H, D_in]   fc1 weight (PyTorch layout), resident
    # b1_ref: [H, 1]      fc1 bias column, resident
    # w2_ref: [H, 1]      fc2 weight column (nb_classes == 1), resident
    # b2_ref: [1, 1]      fc2 bias scalar in SMEM
    # o_ref:  [1, tb]     lane-dense output row

    # TODO(synk): dropout is identity at inference (training=False); no RNG masking here.

    # fc1 on the MXU: [H, D_in] @ [D_in, tb] -> [H, tb], f32 accumulation.
    h = jnp.dot(w1_ref[...], x_ref[...], preferred_element_type=jnp.float32)
    h = h + b1_ref[...]          # lane-broadcast bias
    h = jax.nn.sigmoid(h)        # EUP transcendental

    # fc2 (nb_classes == 1): VPU multiply + sublane reduce instead of an N=1 MXU
    # matmul; stays in f32 throughout (no intermediate downcast).
    o = jnp.sum(h * w2_ref[...], axis=0, keepdims=True)   # [1, tb]
    o = o + b2_ref[0, 0]
    o_ref[...] = o.astype(o_ref.dtype)


def hardaware_feed_forward(x, w1, b1, w2, b2, *, tb=1024):
    """Inference forward of Hardaware_FeedForward for the nb_classes == 1 branch.

    x : [B, D_in] float32
    w1: [H, D_in]   (PyTorch fc1.weight layout)
    b1: [H]         fc1.bias
    w2: [1, H]      (PyTorch fc2.weight layout)
    b2: [1]         fc2.bias
    returns [B, 1]
    """
    B, D_in = x.shape
    H = w1.shape[0]
    assert w1.shape == (H, D_in)
    assert w2.shape == (1, H)

    # Batch tile: a multiple of 128 lanes, capped by the (lane-padded) batch.
    tb = max(_LANE, (min(int(tb), max(B, _LANE)) // _LANE) * _LANE)
    B_pad = pl.cdiv(B, tb) * tb
    grid = (B_pad // tb,)

    # Layout plumbing in the wrapper: feature-major, zero-padded activations.
    x_t = jnp.zeros((D_in, B_pad), x.dtype).at[:, :B].set(x.T)
    b1_col = b1.reshape(H, 1).astype(jnp.float32)
    w2_col = w2.reshape(H, 1).astype(jnp.float32)
    b2_2d = b2.reshape(1, 1).astype(jnp.float32)

    out_row = pl.pallas_call(
        _ff_kernel,
        out_shape=jax.ShapeDtypeStruct((1, B_pad), x.dtype),
        grid_spec=pltpu.PrefetchScalarGridSpec(
            num_scalar_prefetch=0,
            grid=grid,
            in_specs=[
                pl.BlockSpec((D_in, tb), lambda i: (0, i)),   # streamed x tile
                pl.BlockSpec((H, D_in), lambda i: (0, 0)),    # w1 (resident)
                pl.BlockSpec((H, 1), lambda i: (0, 0)),       # b1 (resident)
                pl.BlockSpec((H, 1), lambda i: (0, 0)),       # w2 column (resident)
                pl.BlockSpec(memory_space=pltpu.MemorySpace.SMEM),  # b2 scalar
            ],
            out_specs=pl.BlockSpec((1, tb), lambda i: (0, i)),  # lane-dense output
        ),
        compiler_params=pltpu.CompilerParams(
            dimension_semantics=("parallel",),      # shards grid across TCs on v7x
            vmem_limit_bytes=32 * 1024 * 1024,      # generation-portable budget
        ),
    )(x_t, w1, b1_col, w2_col, b2_2d)

    return out_row[0, :B].reshape(B, 1)


def xavier_uniform(key, shape_out_in, dtype=jnp.float32):
    """Matches torch.nn.init.xavier_uniform_ for a [out, in] weight."""
    fan_out, fan_in = shape_out_in
    limit = jnp.sqrt(6.0 / (fan_in + fan_out))
    return jax.random.uniform(key, shape_out_in, dtype, minval=-limit, maxval=limit)


if __name__ == "__main__":
    # Small shapes consistent with the module: flattened inputs, 1 hidden layer, binary output.
    batch = 16
    input_size = 24
    hidden = 32       # settings.hidden_layers_size[0]
    nb_classes = 1    # -> fc2 has bias (nb_classes == 1 branch)

    key = jax.random.PRNGKey(0)
    kx, k1, k2 = jax.random.split(key, 3)

    x = jax.random.normal(kx, (batch, input_size), dtype=jnp.float32)

    # Deterministic parameter init mirroring weights_init: xavier_uniform weights, bias = 0.01.
    w1 = xavier_uniform(k1, (hidden, input_size))          # PyTorch layout [out, in]
    b1 = jnp.full((hidden,), 0.01, dtype=jnp.float32)
    w2 = xavier_uniform(k2, (nb_classes, hidden))          # [1, hidden]
    b2 = jnp.full((nb_classes,), 0.01, dtype=jnp.float32)

    out = hardaware_feed_forward(x, w1, b1, w2, b2, tb=1024)
    out = jax.block_until_ready(out)

    # Reference check in plain JAX (same math, PyTorch-layout weights).
    ref = jax.nn.sigmoid(x @ w1.T + b1[None, :]) @ w2.T + b2[None, :]
    assert out.shape == (batch, nb_classes)
    assert jnp.allclose(out, ref, atol=1e-5, rtol=1e-5), "mismatch vs reference"

    print("KERNEL_OK")
</pallas_src>

<mosaic_0001>
module attributes {stable_mosaic.version = 11 : i64} {
  func.func @_ff_kernel(%arg0: i32, %arg1: memref<24x128xf32, #tpu.memory_space<vmem>>, %arg2: memref<32x24xf32, #tpu.memory_space<vmem>>, %arg3: memref<32x1xf32, #tpu.memory_space<vmem>>, %arg4: memref<32x1xf32, #tpu.memory_space<vmem>>, %arg5: memref<1x1xf32, #tpu.memory_space<smem>>, %arg6: memref<1x128xf32, #tpu.memory_space<vmem>>) attributes {dimension_semantics = [#tpu.dimension_semantics<parallel>], iteration_bounds = array<i64: 1>, scalar_prefetch = 0 : i64, scratch_operands = 0 : i64, tpu.core_type = #tpu.core_type<tc>, window_params = [{transform_indices = @transform_0, window_bounds = array<i64: 24, 128>}, {pipeline_mode = #tpu.pipeline_mode<synchronous>, transform_indices = @transform_1, window_bounds = array<i64: 32, 24>}, {pipeline_mode = #tpu.pipeline_mode<synchronous>, transform_indices = @transform_2, window_bounds = array<i64: 32, 1>}, {pipeline_mode = #tpu.pipeline_mode<synchronous>, transform_indices = @transform_3, window_bounds = array<i64: 32, 1>}, {transform_indices = @transform_4, window_bounds = array<i64: 1, 1>}, {transform_indices = @transform_5, window_bounds = array<i64: 1, 128>}]} {
    %c0 = arith.constant 0 : index
    %c0_0 = arith.constant 0 : index
    %0 = vector.load %arg2[%c0, %c0_0] : memref<32x24xf32, #tpu.memory_space<vmem>>, vector<32x24xf32>
    %c0_1 = arith.constant 0 : index
    %c0_2 = arith.constant 0 : index
    %1 = vector.load %arg1[%c0_1, %c0_2] : memref<24x128xf32, #tpu.memory_space<vmem>>, vector<24x128xf32>
    %cst = arith.constant dense<0.000000e+00> : vector<32x128xf32>
    %2 = tpu.matmul %0, %1, %cst {dimension_numbers = #tpu.dot_dimension_numbers<[1], [0], [0], [1], [0, 0, 1, 1], [], []>} : vector<32x24xf32>, vector<24x128xf32>, vector<32x128xf32> -> vector<32x128xf32>
    %c0_3 = arith.constant 0 : index
    %c0_4 = arith.constant 0 : index
    %3 = vector.load %arg3[%c0_3, %c0_4] : memref<32x1xf32, #tpu.memory_space<vmem>>, vector<32x1xf32>
    %4 = vector.broadcast %3 : vector<32x1xf32> to vector<32x128xf32>
    %5 = arith.addf %2, %4 : vector<32x128xf32>
    %6 = arith.negf %5 : vector<32x128xf32>
    %7 = math.exp %6 : vector<32x128xf32>
    %cst_5 = arith.constant 1.000000e+00 : f32
    %8 = vector.broadcast %cst_5 : f32 to vector<32x128xf32>
    %9 = arith.addf %8, %7 : vector<32x128xf32>
    %10 = arith.divf %8, %9 : vector<32x128xf32>
    %c0_6 = arith.constant 0 : index
    %c0_7 = arith.constant 0 : index
    %11 = vector.load %arg4[%c0_6, %c0_7] : memref<32x1xf32, #tpu.memory_space<vmem>>, vector<32x1xf32>
    %12 = vector.broadcast %11 : vector<32x1xf32> to vector<32x128xf32>
    %13 = arith.mulf %10, %12 : vector<32x128xf32>
    %cst_8 = arith.constant dense<0.000000e+00> : vector<128xf32>
    %14 = vector.multi_reduction <add>, %13, %cst_8 [0] : vector<32x128xf32> to vector<128xf32>
    %15 = vector.shape_cast %14 : vector<128xf32> to vector<1x128xf32>
    %c0_9 = arith.constant 0 : index
    %c0_10 = arith.constant 0 : index
    %16 = memref.load %arg5[%c0_9, %c0_10] : memref<1x1xf32, #tpu.memory_space<smem>>
    %17 = vector.broadcast %16 : f32 to vector<1x128xf32>
    %18 = arith.addf %15, %17 : vector<1x128xf32>
    %c0_11 = arith.constant 0 : index
    %c0_12 = arith.constant 0 : index
    %19 = vector.load %arg6[%c0_11, %c0_12] : memref<1x128xf32, #tpu.memory_space<vmem>>, vector<1x128xf32>
    tpu.vector_store %arg6[%c0_11, %c0_12], %18 {strides = array<i32>} : memref<1x128xf32, #tpu.memory_space<vmem>>, vector<1x128xf32>,
    return
  }
  func.func @transform_0(%arg0: i32) -> (i32, i32) {
    %c0_i32 = arith.constant 0 : i32
    %c0_i32_0 = arith.constant 0 : i32
    return %c0_i32, %arg0 : i32, i32
  }
  func.func @transform_1(%arg0: i32) -> (i32, i32) {
    %c0_i32 = arith.constant 0 : i32
    %c0_i32_0 = arith.constant 0 : i32
    %c0_i32_1 = arith.constant 0 : i32
    return %c0_i32, %c0_i32_0 : i32, i32
  }
  func.func @transform_2(%arg0: i32) -> (i32, i32) {
    %c0_i32 = arith.constant 0 : i32
    %c0_i32_0 = arith.constant 0 : i32
    %c0_i32_1 = arith.constant 0 : i32
    return %c0_i32, %c0_i32_0 : i32, i32
  }
  func.func @transform_3(%arg0: i32) -> (i32, i32) {
    %c0_i32 = arith.constant 0 : i32
    %c0_i32_0 = arith.constant 0 : i32
    %c0_i32_1 = arith.constant 0 : i32
    return %c0_i32, %c0_i32_0 : i32, i32
  }
  func.func @transform_4(%arg0: i32) -> (i32, i32) {
    %c0_i32 = arith.constant 0 : i32
    %c0_i32_0 = arith.constant 0 : i32
    %c0_i32_1 = arith.constant 0 : i32
    return %c0_i32, %c0_i32_0 : i32, i32
  }
  func.func @transform_5(%arg0: i32) -> (i32, i32) {
    %c0_i32 = arith.constant 0 : i32
    %c0_i32_0 = arith.constant 0 : i32
    return %c0_i32, %arg0 : i32, i32
  }
}

</mosaic_0001>

<bundles_post_ra>
// kernel: tpu_custom_call.1
= control target key start
LH: loop header
LB: loop body
LE: loop exit
PB: predicated region body
PF: predicated region fallthrough
CT: control target
= control target key end

     0   :  { %v292_v1 = vmov 0   ;;  %s375_s0 = inlined_call_operand.vmem [shape: f32[24,128], index: 0, kind: input, shape index: {}]   ;;  %s376_s1 = inlined_call_operand.vmem [shape: f32[32,24], index: 1, kind: input, shape index: {}]   ;;  %s377_s2 = inlined_call_operand.vmem [shape: f32[32,1], index: 2, kind: input, shape index: {}]   ;;  %s378_s3 = inlined_call_operand.vmem [shape: f32[32,1], index: 3, kind: input, shape index: {}]   ;;  %s379_s4 = inlined_call_operand.<no memory space> [shape: f32[1,1], index: 4, kind: input, shape index: {}]   ;;  %s380_s5 = inlined_call_operand.hbm [shape: f32[1,128], index: 5, kind: output, shape index: {}]  }
   0x1   :  { %v28_v0 = vld [vmem:[%s375_s0 + $0x10] sm:$0xff]  ;;  %248 = vset.pattern.permute.xlu1 %v292_v1  ;;  %247 = vset.pattern.permute.xlu0 %v292_v1  ;;  %v29_v3 = vld [vmem:[%s377_s2] sm:$0xff]  ;;  %v27_v4 = vld [vmem:[%s375_s0 + $0x8] sm:$0xff] }
   0x2   :  { %v31_v2 = vld [vmem:[%s377_s2 + $0x10] sm:$0xff]  ;;  %79 = vmatpush.msra.mxu0 %v28_v0  ;;  %236 = vmatpush.msra.mxu1 %v28_v0  ;;  %v26_v5 = vld [vmem:[%s375_s0] sm:$0xff] }
   0x3   :  { %237 = vmatpush.msra.mxu2 %v28_v0  ;;  %238 = vmatpush.msra.mxu3 %v28_v0 }
   0x4   :  { %45 = vperm.xlu1 %248, %v31_v2   ;;  %35 = vperm.xlu0 %247, %v29_v3  }
   0x5   :  { %80 = vmatpush.msra.mxu0 %v27_v4  ;;  %239 = vmatpush.msra.mxu1 %v27_v4 }
   0x6   :  { %11 = vsyncpa [#allocation4], 0  ;;  %240 = vmatpush.msra.mxu2 %v27_v4  ;;  %241 = vmatpush.msra.mxu3 %v27_v4  ;;  %v22_v6 = vld [vmem:[%s376_s1] sm:$0xff]  ;;  %vm53_vm0 = vcmask 195584   ;;  %v23_v7 = vld [vmem:[%s376_s1 + $0x8] sm:$0xff]  ;;  %s293_s21 = smov [#allocation3]  }
   0x7   :  { %81 = vmatpush.msra.mxu0 %v26_v5  ;;  %242 = vmatpush.msra.mxu1 %v26_v5  ;;  %v24_v8 = vld [vmem:[%s376_s1 + $0x10] sm:$0xff]  ;;  %v25_v9 = vld [vmem:[%s376_s1 + $0x18] sm:$0xff]  ;;  %v30_v11 = vld [vmem:[%s377_s2 + $0x8] sm:$0xff]  ;;  %s217_s22 = sshll.u32 %s293_s21, 4  ;;  %s219_s25 = sshll.u32 %s380_s5, 4  ;;  %s218_s22 = int_to_ptr.vmem [resolvable:$true] %s217_s22  ;;  %s220_s25 = int_to_ptr.hbm [resolvable:$true] %s219_s25 }
   0x8   :  { %243 = vmatpush.msra.mxu2 %v26_v5  ;;  %244 = vmatpush.msra.mxu3 %v26_v5  ;;  %v32_v10 = vld [vmem:[%s377_s2 + $0x18] sm:$0xff]  ;;  %v171_v12 = vld [vmem:[%s378_s3] sm:$0xff]  ;;  %v173_v14 = vld [vmem:[%s378_s3 + $0x10] sm:$0xff] }
   0x9   :  { %228 = vmatmul.msk.f32.vlgmr.msra.gmra.mxu0 %vm53_vm0, %v22_v6  ;;  %229 = vmatmul.msk.f32.vlgmr.msra.gmra.mxu1 %vm53_vm0, %v23_v7  ;;  %v174_v13 = vld [vmem:[%s378_s3 + $0x18] sm:$0xff]  ;;  %v172_v15 = vld [vmem:[%s378_s3 + $0x8] sm:$0xff] }
   0xa   :  { %230 = vmatmul.msk.f32.vlgmr.msra.gmra.mxu2 %vm53_vm0, %v24_v8  ;;  %231 = vmatmul.msk.f32.vlgmr.msra.gmra.mxu3 %vm53_vm0, %v25_v9 }
   0xb   :  { %249 = vset.pattern.permute.xlu2 %v292_v1 }
   0xc   :  { %50 = vperm.xlu1 %248, %v32_v10   ;;  %40 = vperm.xlu0 %247, %v30_v11  }
   0xd   :  { %177 = vperm.xlu2 %249, %v171_v12  }
  0x14   :  { %192 = vperm.xlu1 %248, %v174_v13   ;;  %187 = vperm.xlu0 %247, %v173_v14  }
  0x15   :  { %182 = vperm.xlu2 %249, %v172_v15  }
  0x67   :  { %v178_v44 = vpop.permute.xlu2 %177 }
  0x6f   :  { %v183_v7 = vpop.permute.xlu2 %182 }
  0x76   :  { %v36_v16 = vpop.permute.xlu0 %35  ;;  %v46_v17 = vpop.permute.xlu1 %45 }
  0x7e   :  { %v41_v18 = vpop.permute.xlu0 %40  ;;  %v51_v25 = vpop.permute.xlu1 %50 }
  0x86   :  { %v83_v19 = vpop.f32.mrf.mxu0  ;;  %v86_v20 = vpop.f32.mrf.mxu1 }
  0x87   :  { %v84_v21 = vadd.f32 %v83_v19, %v36_v16  ;;  %v87_v22 = vadd.f32 %v86_v20, %v41_v18 }
  0x89   :  { %v232_v23 = vmul.f32 -1.442695, %v84_v21  ;;  %v233_v24 = vmul.f32 -1.442695, %v87_v22 }
  0x8b   :  { %250 = vpow2.f32 %v232_v23  ;;  %v193_v23 = vpop.permute.xlu1 %192 }
  0x8c   :  { %252 = vpow2.f32 %v233_v24 }
  0x8d   :  { %v89_v26 = vpop.f32.mrf.mxu2  ;;  %v92_v27 = vpop.f32.mrf.mxu3 }
  0x8e   :  { %v90_v28 = vadd.f32 %v89_v26, %v46_v17  ;;  %v93_v29 = vadd.f32 %v92_v27, %v51_v25  ;;  %v188_v17 = vpop.permute.xlu0 %187 }
  0x90   :  { %v234_v30 = vmul.f32 -1.442695, %v90_v28  ;;  %v235_v31 = vmul.f32 -1.442695, %v93_v29 }
  0x91   :  { %v251_v32 = vpop.eup %250 }
  0x92   :  { %v253_v33 = vpop.eup %252  ;;  %v107_v34 = vadd.f32 1.0, %v251_v32  ;;  %254 = vpow2.f32 %v234_v30  ;;  %v209_v32 = vstv %s379_s4 }
  0x93   :  { %v108_v35 = vadd.f32 1.0, %v253_v33  ;;  %256 = vpow2.f32 %v235_v31 }
  0x94   :  { %258 = vrcp.f32 %v107_v34  ;;  %v122_v48 = vand.u32 2147483648, %v107_v34  ;;  %v120_v50 = vand.u32 2147483647, %v107_v34  ;;  %vm116_vm3 = vweird.f32 %v107_v34 }
  0x95   :  { %260 = vrcp.f32 %v108_v35  ;;  %v137_v49 = vand.u32 2147483648, %v108_v35  ;;  %v135_v52 = vand.u32 2147483647, %v108_v35  ;;  %vm131_vm5 = vweird.f32 %v108_v35 }
  0x96   :  { %v123_v60 = vor.u32 1.1754944e-38, %v122_v48  ;;  %vm121_vm7 = vcmp.eq.f32.partialorder %v120_v50, 8.507059e+37 }
  0x97   :  { %v138_v61 = vor.u32 1.1754944e-38, %v137_v49  ;;  %vm136_vm8 = vcmp.eq.f32.partialorder %v135_v52, 8.507059e+37 }
  0x98   :  { %v255_v36 = vpop.eup %254 }
  0x99   :  { %v257_v37 = vpop.eup %256  ;;  %v109_v38 = vadd.f32 1.0, %v255_v36 }
  0x9a   :  { %v259_v39 = vpop.eup %258  ;;  %v110_v40 = vadd.f32 1.0, %v257_v37 }
  0x9b   :  { %v261_v41 = vpop.eup %260  ;;  %262 = vrcp.f32 %v109_v38  ;;  %v112_v42 = vmul.f32 %v259_v39, %v107_v34  ;;  %vm117_vm1 = vweird.f32 %v259_v39  ;;  %v152_v3 = vand.u32 2147483648, %v109_v38 }
  0x9c   :  { %264 = vrcp.f32 %v110_v40  ;;  %v127_v43 = vmul.f32 %v261_v41, %v108_v35  ;;  %vm132_vm2 = vweird.f32 %v261_v41  ;;  %vm118_vm4 = vmor %vm116_vm3, %vm117_vm1  ;;  %v150_v5 = vand.u32 2147483647, %v109_v38 }
  0x9d   :  { %v113_v45 = vsub.f32 1.0, %v112_v42  ;;  %vm133_vm6 = vmor %vm131_vm5, %vm132_vm2  ;;  %v167_v6 = vand.u32 2147483648, %v110_v40  ;;  %v165_v9 = vand.u32 2147483647, %v110_v40  ;;  %vm146_vm11 = vweird.f32 %v109_v38 }
  0x9e   :  { %v128_v46 = vsub.f32 1.0, %v127_v43  ;;  %v153_v13 = vor.u32 1.1754944e-38, %v152_v3  ;;  %vm161_vm13 = vweird.f32 %v110_v40  ;;  %vm151_vm14 = vcmp.eq.f32.partialorder %v150_v5, 8.507059e+37 }
  0x9f   :  { %v114_v47 = vmul.f32 %v259_v39, %v113_v45  ;;  %v168_v16 = vor.u32 1.1754944e-38, %v167_v6  ;;  %vm166_vm0 = vcmp.eq.f32.partialorder %v165_v9, 8.507059e+37 }
  0xa0   :  { %v129_v51 = vmul.f32 %v261_v41, %v128_v46 }
  0xa1   :  { %v263_v53 = vpop.eup %262  ;;  %v115_v54 = vadd.f32 %v259_v39, %v114_v47 }
  0xa2   :  { %v265_v55 = vpop.eup %264  ;;  %v142_v56 = vmul.f32 %v263_v53, %v109_v38  ;;  %v130_v57 = vadd.f32 %v261_v41, %v129_v51  ;;  %vm147_vm9 = vweird.f32 %v263_v53 }
  0xa3   :  { %v157_v58 = vmul.f32 %v265_v55, %v110_v40  ;;  %v119_v59 = vsel %vm118_vm4, %v259_v39, %v115_v54  ;;  %vm162_vm10 = vweird.f32 %v265_v55  ;;  %vm148_vm12 = vmor %vm146_vm11, %vm147_vm9 }
  0xa4   :  { %v143_v62 = vsub.f32 1.0, %v142_v56  ;;  %v134_v63 = vsel %vm133_vm6, %v261_v41, %v130_v57  ;;  %v124_v1 = vsel %vm121_vm7, %v123_v60, %v119_v59  ;;  %vm163_vm15 = vmor %vm161_vm13, %vm162_vm10 }
  0xa5   :  { %v158_v0 = vsub.f32 1.0, %v157_v58  ;;  %v139_v2 = vsel %vm136_vm8, %v138_v61, %v134_v63  ;;  %v195_v10 = vmul.f32 %v178_v44, %v124_v1 }
  0xa6   :  { %v144_v4 = vmul.f32 %v263_v53, %v143_v62  ;;  %v196_v12 = vmul.f32 %v183_v7, %v139_v2 }
  0xa7   :  { %v159_v8 = vmul.f32 %v265_v55, %v158_v0 }
  0xa8   :  { %v145_v11 = vadd.f32 %v263_v53, %v144_v4  ;;  %v199_v22 = vadd.f32 %v196_v12, %v195_v10 }
  0xa9   :  { %v160_v14 = vadd.f32 %v265_v55, %v159_v8 }
  0xaa   :  { %v149_v15 = vsel %vm148_vm12, %v263_v53, %v145_v11 }
  0xab   :  { %v154_v18 = vsel %vm151_vm14, %v153_v13, %v149_v15  ;;  %v164_v19 = vsel %vm163_vm15, %v265_v55, %v160_v14 }
  0xac   :  { %v169_v20 = vsel %vm166_vm0, %v168_v16, %v164_v19  ;;  %v197_v21 = vmul.f32 %v188_v17, %v154_v18 }
  0xad   :  { %v198_v24 = vmul.f32 %v193_v23, %v169_v20 }
  0xae   :  { %v200_v25 = vadd.f32 %v199_v22, %v197_v21 }
  0xb0   :  { %v201_v26 = vadd.f32 %v200_v25, %v198_v24 }
  0xb2   :  { %v202_v27 = vrot.slane %v201_v26, 4 }
  0xb4   :  { %v203_v28 = vadd.f32 %v202_v27, %v201_v26 }
  0xb6   :  { %v204_v29 = vrot.slane %v203_v28, 2 }
  0xb8   :  { %v205_v30 = vadd.f32 %v204_v29, %v203_v28 }
  0xba   :  { %v206_v31 = vrot.slane %v205_v30, 1 }
  0xbc   :  { %v207_v33 = vadd.f32 %v206_v31, %v205_v30 }
  0xbe   :  { %v210_v34 = vadd.f32 %v209_v32, %v207_v33 }
  0xc0   :  { %211 = vst [vmem:[#allocation3] sm:$0x1] %v210_v34 }
  0xc1   :  { %222 = dma.vmem_to_hbm [thread:$0]  %s218_s22, 16, %s220_s25, [#allocation4]  }
  0xc2   :  { %290 = dma.done.wait [#allocation4], 16  }
  0xc3   :  { %291 = vsyncadd [#allocation4], 4294967280 }
  0xc4   :  { %227 = vsyncpa [#allocation4], 1 }

</bundles_post_ra>
